<compile_context>
chip_gen: v5e
topology: v5e:2x2
jax: 0.10.0
libtpu: 0.0.40
codegen_flags: <defaults>
</compile_context>

<pallas_src>
import jax
import jax.numpy as jnp
from jax.experimental import pallas as pl
from jax.experimental.pallas import tpu as pltpu


def fuzzy_layer_kernel(x_ref, c_ref, inv_ref, red_ref, dw1_ref, dw2_ref, db_ref, o_ref):
    x = x_ref[...]        # (TB, D)    batch tile
    c = c_ref[...]        # (D, K)     fuzzy centers
    inv = inv_ref[...]    # (D, K)     precomputed 1/(2*sigma^2)
    red = red_ref[...]    # (K, 128)   columns: [sw, sb, ones, 0, ...]
    dw1 = dw1_ref[...]    # (D, Opad)  defuzz weight, first half (AND branch)
    dw2 = dw2_ref[...]    # (D, Opad)  defuzz weight, second half (OR branch)
    db = db_ref[...]      # (1, Opad)  defuzz bias

    D = c.shape[0]

    # ---- membership stage: unrolled over D, running max/min in (TB, K) ----
    def z2_at(d):
        z = (x[:, d:d + 1] - c[d:d + 1, :]) * inv[d:d + 1, :]   # (TB, K), VPU FMA
        return z * z

    zmax = z2_at(0)
    zmin = zmax
    for d in range(1, D):
        z2 = z2_at(d)
        zmax = jnp.maximum(zmax, z2)
        zmin = jnp.minimum(zmin, z2)

    # exp AFTER the D-reduction (exact: exp(-t) is strictly decreasing):
    #   AND rule = min_d fuzz = exp(-max_d z2),  OR rule = max_d fuzz = exp(-min_d z2)
    x1 = jnp.exp(-zmax)                                          # (TB, K)
    x2 = jnp.exp(-zmin)                                          # (TB, K)

    # ---- K-reductions on the MXU: one matvec gives [x·sw, x·sb, sum(x)] ----
    r1 = jnp.dot(x1, red, preferred_element_type=jnp.float32)    # (TB, 128)
    r2 = jnp.dot(x2, red, preferred_element_type=jnp.float32)    # (TB, 128)
    s1, t1, n1 = r1[:, 0:1], r1[:, 1:2], r1[:, 2:3]
    s2, t2, n2 = r2[:, 0:1], r2[:, 1:2], r2[:, 2:3]

    # Collapsed normalization + SubLayer consequent (exact; no eps, as in module):
    #   x1_sub[b, d] = x[b,d] * (x1·sw)/S1 + (x1·sb)/S1
    rcp1 = 1.0 / n1
    rcp2 = 1.0 / n2
    x1_sub = x * (s1 * rcp1) + t1 * rcp1                         # (TB, D)
    x2_sub = x * (s2 * rcp2) + t2 * rcp2                         # (TB, D)

    # ---- defuzzification: two small MXU dots, no lane concatenate ----
    out = (jnp.dot(x1_sub, dw1, preferred_element_type=jnp.float32)
           + jnp.dot(x2_sub, dw2, preferred_element_type=jnp.float32)
           + db)
    o_ref[...] = out.astype(o_ref.dtype)


def fuzzy_layer(x, centers, sigma, sub_w, sub_b, defuzz_w, defuzz_b, *, block_b=2048):
    B, D = x.shape
    K = centers.shape[1]
    O = defuzz_w.shape[1]

    # Hoisted constant math (resident params; computed once, not per grid step).
    inv = (1.0 / (2.0 * sigma * sigma)).astype(jnp.float32)

    # MXU reduction matrix: columns [sw, sb, ones], lane-padded to 128.
    red = jnp.zeros((K, 128), jnp.float32)
    red = red.at[:, 0].set(sub_w[0].astype(jnp.float32))
    red = red.at[:, 1].set(sub_b[0].astype(jnp.float32))
    red = red.at[:, 2].set(1.0)

    # Lane-dense output: pad O up to a multiple of 128 (unmasked vst stores).
    O_pad = pl.cdiv(O, 128) * 128
    if O_pad != O:
        defuzz_w = jnp.pad(defuzz_w, ((0, 0), (0, O_pad - O)))
        defuzz_b = jnp.pad(defuzz_b, ((0, 0), (0, O_pad - O)))
    dw1 = defuzz_w[:D, :]     # AND-branch half
    dw2 = defuzz_w[D:, :]     # OR-branch half

    # Batch tiling: big tiles to amortize ~0.35us per-step overhead; keep the grid
    # length >= 2 when B >= 16 so v7x's two TensorCores both get work.
    num_tiles = max(pl.cdiv(B, block_b), 2 if B >= 16 else 1)
    TB = pl.cdiv(pl.cdiv(B, num_tiles), 8) * 8          # multiple of 8 sublanes
    B_pad = num_tiles * TB
    if B_pad != B:
        x = jnp.pad(x, ((0, B_pad - B), (0, 0)))        # zero rows are NaN-safe

    out = pl.pallas_call(
        fuzzy_layer_kernel,
        out_shape=jax.ShapeDtypeStruct((B_pad, O_pad), jnp.float32),
        grid=(num_tiles,),
        in_specs=[
            pl.BlockSpec((TB, D), lambda i: (i, 0)),        # x: tiled over batch
            pl.BlockSpec((D, K), lambda i: (0, 0)),         # centers (resident)
            pl.BlockSpec((D, K), lambda i: (0, 0)),         # 1/(2*sigma^2)
            pl.BlockSpec((K, 128), lambda i: (0, 0)),       # MXU reduction matrix
            pl.BlockSpec((D, O_pad), lambda i: (0, 0)),     # defuzz weight (AND half)
            pl.BlockSpec((D, O_pad), lambda i: (0, 0)),     # defuzz weight (OR half)
            pl.BlockSpec((1, O_pad), lambda i: (0, 0)),     # defuzz bias
        ],
        out_specs=pl.BlockSpec((TB, O_pad), lambda i: (i, 0)),
        compiler_params=pltpu.CompilerParams(
            dimension_semantics=("parallel",)),             # megacore-shardable
    )(x, centers, inv, red, dw1, dw2, defuzz_b)
    return out[:B, :O]


def fuzzy_layer_ref(x, centers, sigma, sub_w, sub_b, defuzz_w, defuzz_b):
    """Pure-JAX reference mirroring the PyTorch forward exactly."""
    xm = x[:, :, None]
    fuzz = jnp.exp(-(((xm - centers[None]) / (2.0 * sigma[None] ** 2)) ** 2))
    sub = xm * sub_w[None] + sub_b[None]          # SubLayer: Linear(1->K) on x.unsqueeze(-1)
    x1 = jnp.min(fuzz, axis=1)
    x2 = jnp.max(fuzz, axis=1)
    x1 = x1 / jnp.sum(x1, axis=1, keepdims=True)
    x2 = x2 / jnp.sum(x2, axis=1, keepdims=True)
    x1_sub = jnp.sum(x1[:, None, :] * sub, axis=2)
    x2_sub = jnp.sum(x2[:, None, :] * sub, axis=2)
    cat = jnp.concatenate([x1_sub, x2_sub], axis=1)
    return cat @ defuzz_w + defuzz_b


if __name__ == "__main__":
    # Small shapes implied by the module: x is (batch, input_dim)
    B, D, K, O = 8, 8, 128, 8   # batch, input_dim, k (rules), output_dim

    key = jax.random.PRNGKey(0)
    k_x, k_c, k_sw, k_sb, k_dw, k_db = jax.random.split(key, 6)

    x = jax.random.normal(k_x, (B, D), dtype=jnp.float32)

    # Fuzzification params: centers ~ randn(D, K), sigma = ones(D, K)
    centers = jax.random.normal(k_c, (D, K), dtype=jnp.float32)
    sigma = jnp.ones((D, K), dtype=jnp.float32)

    # SubLayer = nn.Linear(1, K): weight (K,1), bias (K,) -> stored as (1, K)
    sub_w = jax.random.uniform(k_sw, (1, K), jnp.float32, -1.0, 1.0)
    sub_b = jax.random.uniform(k_sb, (1, K), jnp.float32, -1.0, 1.0)

    # Defuzzification = nn.Linear(2*D, O): stored transposed (2*D, O), bias (1, O)
    bound = 1.0 / jnp.sqrt(2.0 * D)
    defuzz_w = jax.random.uniform(k_dw, (2 * D, O), jnp.float32, -bound, bound)
    defuzz_b = jax.random.uniform(k_db, (1, O), jnp.float32, -bound, bound)

    out = fuzzy_layer(x, centers, sigma, sub_w, sub_b, defuzz_w, defuzz_b)
    out = jax.block_until_ready(out)

    ref = fuzzy_layer_ref(x, centers, sigma, sub_w, sub_b, defuzz_w, defuzz_b)
    assert out.shape == (B, O)
    max_err = float(jnp.max(jnp.abs(out - ref)))
    assert jnp.allclose(out, ref, atol=1e-4, rtol=1e-4), f"mismatch vs reference (max|diff|={max_err})"

    print("KERNEL_OK")
</pallas_src>

<mosaic_0001>
module attributes {stable_mosaic.version = 11 : i64} {
  func.func @fuzzy_layer_kernel(%arg0: i32, %arg1: memref<8x8xf32, #tpu.memory_space<vmem>>, %arg2: memref<8x128xf32, #tpu.memory_space<vmem>>, %arg3: memref<8x128xf32, #tpu.memory_space<vmem>>, %arg4: memref<128x128xf32, #tpu.memory_space<vmem>>, %arg5: memref<8x128xf32, #tpu.memory_space<vmem>>, %arg6: memref<8x128xf32, #tpu.memory_space<vmem>>, %arg7: memref<1x128xf32, #tpu.memory_space<vmem>>, %arg8: memref<8x128xf32, #tpu.memory_space<vmem>>) attributes {dimension_semantics = [#tpu.dimension_semantics<parallel>], iteration_bounds = array<i64: 1>, scalar_prefetch = 0 : i64, scratch_operands = 0 : i64, tpu.core_type = #tpu.core_type<tc>, window_params = [{transform_indices = @transform_0, window_bounds = array<i64: 8, 8>}, {pipeline_mode = #tpu.pipeline_mode<synchronous>, transform_indices = @transform_1, window_bounds = array<i64: 8, 128>}, {pipeline_mode = #tpu.pipeline_mode<synchronous>, transform_indices = @transform_2, window_bounds = array<i64: 8, 128>}, {pipeline_mode = #tpu.pipeline_mode<synchronous>, transform_indices = @transform_3, window_bounds = array<i64: 128, 128>}, {pipeline_mode = #tpu.pipeline_mode<synchronous>, transform_indices = @transform_4, window_bounds = array<i64: 8, 128>}, {pipeline_mode = #tpu.pipeline_mode<synchronous>, transform_indices = @transform_5, window_bounds = array<i64: 8, 128>}, {pipeline_mode = #tpu.pipeline_mode<synchronous>, transform_indices = @transform_6, window_bounds = array<i64: 1, 128>}, {transform_indices = @transform_7, window_bounds = array<i64: 8, 128>}]} {
    %c0 = arith.constant 0 : index
    %c0_0 = arith.constant 0 : index
    %0 = vector.load %arg1[%c0, %c0_0] : memref<8x8xf32, #tpu.memory_space<vmem>>, vector<8x8xf32>
    %c0_1 = arith.constant 0 : index
    %c0_2 = arith.constant 0 : index
    %1 = vector.load %arg2[%c0_1, %c0_2] : memref<8x128xf32, #tpu.memory_space<vmem>>, vector<8x128xf32>
    %c0_3 = arith.constant 0 : index
    %c0_4 = arith.constant 0 : index
    %2 = vector.load %arg3[%c0_3, %c0_4] : memref<8x128xf32, #tpu.memory_space<vmem>>, vector<8x128xf32>
    %c0_5 = arith.constant 0 : index
    %c0_6 = arith.constant 0 : index
    %3 = vector.load %arg4[%c0_5, %c0_6] : memref<128x128xf32, #tpu.memory_space<vmem>>, vector<128x128xf32>
    %c0_7 = arith.constant 0 : index
    %c0_8 = arith.constant 0 : index
    %4 = vector.load %arg5[%c0_7, %c0_8] : memref<8x128xf32, #tpu.memory_space<vmem>>, vector<8x128xf32>
    %c0_9 = arith.constant 0 : index
    %c0_10 = arith.constant 0 : index
    %5 = vector.load %arg6[%c0_9, %c0_10] : memref<8x128xf32, #tpu.memory_space<vmem>>, vector<8x128xf32>
    %c0_11 = arith.constant 0 : index
    %c0_12 = arith.constant 0 : index
    %6 = vector.load %arg7[%c0_11, %c0_12] : memref<1x128xf32, #tpu.memory_space<vmem>>, vector<1x128xf32>
    %7 = vector.extract_strided_slice %0 {offsets = [0, 0], sizes = [8, 1], strides = [1, 1]} : vector<8x8xf32> to vector<8x1xf32>
    %8 = vector.extract_strided_slice %1 {offsets = [0, 0], sizes = [1, 128], strides = [1, 1]} : vector<8x128xf32> to vector<1x128xf32>
    %9 = vector.broadcast %7 : vector<8x1xf32> to vector<8x128xf32>
    %10 = vector.broadcast %8 : vector<1x128xf32> to vector<8x128xf32>
    %11 = arith.subf %9, %10 : vector<8x128xf32>
    %12 = vector.extract_strided_slice %2 {offsets = [0, 0], sizes = [1, 128], strides = [1, 1]} : vector<8x128xf32> to vector<1x128xf32>
    %13 = vector.broadcast %12 : vector<1x128xf32> to vector<8x128xf32>
    %14 = arith.mulf %11, %13 : vector<8x128xf32>
    %15 = arith.mulf %14, %14 : vector<8x128xf32>
    %16 = vector.extract_strided_slice %0 {offsets = [0, 1], sizes = [8, 1], strides = [1, 1]} : vector<8x8xf32> to vector<8x1xf32>
    %17 = vector.extract_strided_slice %1 {offsets = [1, 0], sizes = [1, 128], strides = [1, 1]} : vector<8x128xf32> to vector<1x128xf32>
    %18 = vector.broadcast %16 : vector<8x1xf32> to vector<8x128xf32>
    %19 = vector.broadcast %17 : vector<1x128xf32> to vector<8x128xf32>
    %20 = arith.subf %18, %19 : vector<8x128xf32>
    %21 = vector.extract_strided_slice %2 {offsets = [1, 0], sizes = [1, 128], strides = [1, 1]} : vector<8x128xf32> to vector<1x128xf32>
    %22 = vector.broadcast %21 : vector<1x128xf32> to vector<8x128xf32>
    %23 = arith.mulf %20, %22 : vector<8x128xf32>
    %24 = arith.mulf %23, %23 : vector<8x128xf32>
    %25 = arith.maximumf %15, %24 : vector<8x128xf32>
    %26 = arith.minimumf %15, %24 : vector<8x128xf32>
    %27 = vector.extract_strided_slice %0 {offsets = [0, 2], sizes = [8, 1], strides = [1, 1]} : vector<8x8xf32> to vector<8x1xf32>
    %28 = vector.extract_strided_slice %1 {offsets = [2, 0], sizes = [1, 128], strides = [1, 1]} : vector<8x128xf32> to vector<1x128xf32>
    %29 = vector.broadcast %27 : vector<8x1xf32> to vector<8x128xf32>
    %30 = vector.broadcast %28 : vector<1x128xf32> to vector<8x128xf32>
    %31 = arith.subf %29, %30 : vector<8x128xf32>
    %32 = vector.extract_strided_slice %2 {offsets = [2, 0], sizes = [1, 128], strides = [1, 1]} : vector<8x128xf32> to vector<1x128xf32>
    %33 = vector.broadcast %32 : vector<1x128xf32> to vector<8x128xf32>
    %34 = arith.mulf %31, %33 : vector<8x128xf32>
    %35 = arith.mulf %34, %34 : vector<8x128xf32>
    %36 = arith.maximumf %25, %35 : vector<8x128xf32>
    %37 = arith.minimumf %26, %35 : vector<8x128xf32>
    %38 = vector.extract_strided_slice %0 {offsets = [0, 3], sizes = [8, 1], strides = [1, 1]} : vector<8x8xf32> to vector<8x1xf32>
    %39 = vector.extract_strided_slice %1 {offsets = [3, 0], sizes = [1, 128], strides = [1, 1]} : vector<8x128xf32> to vector<1x128xf32>
    %40 = vector.broadcast %38 : vector<8x1xf32> to vector<8x128xf32>
    %41 = vector.broadcast %39 : vector<1x128xf32> to vector<8x128xf32>
    %42 = arith.subf %40, %41 : vector<8x128xf32>
    %43 = vector.extract_strided_slice %2 {offsets = [3, 0], sizes = [1, 128], strides = [1, 1]} : vector<8x128xf32> to vector<1x128xf32>
    %44 = vector.broadcast %43 : vector<1x128xf32> to vector<8x128xf32>
    %45 = arith.mulf %42, %44 : vector<8x128xf32>
    %46 = arith.mulf %45, %45 : vector<8x128xf32>
    %47 = arith.maximumf %36, %46 : vector<8x128xf32>
    %48 = arith.minimumf %37, %46 : vector<8x128xf32>
    %49 = vector.extract_strided_slice %0 {offsets = [0, 4], sizes = [8, 1], strides = [1, 1]} : vector<8x8xf32> to vector<8x1xf32>
    %50 = vector.extract_strided_slice %1 {offsets = [4, 0], sizes = [1, 128], strides = [1, 1]} : vector<8x128xf32> to vector<1x128xf32>
    %51 = vector.broadcast %49 : vector<8x1xf32> to vector<8x128xf32>
    %52 = vector.broadcast %50 : vector<1x128xf32> to vector<8x128xf32>
    %53 = arith.subf %51, %52 : vector<8x128xf32>
    %54 = vector.extract_strided_slice %2 {offsets = [4, 0], sizes = [1, 128], strides = [1, 1]} : vector<8x128xf32> to vector<1x128xf32>
    %55 = vector.broadcast %54 : vector<1x128xf32> to vector<8x128xf32>
    %56 = arith.mulf %53, %55 : vector<8x128xf32>
    %57 = arith.mulf %56, %56 : vector<8x128xf32>
    %58 = arith.maximumf %47, %57 : vector<8x128xf32>
    %59 = arith.minimumf %48, %57 : vector<8x128xf32>
    %60 = vector.extract_strided_slice %0 {offsets = [0, 5], sizes = [8, 1], strides = [1, 1]} : vector<8x8xf32> to vector<8x1xf32>
    %61 = vector.extract_strided_slice %1 {offsets = [5, 0], sizes = [1, 128], strides = [1, 1]} : vector<8x128xf32> to vector<1x128xf32>
    %62 = vector.broadcast %60 : vector<8x1xf32> to vector<8x128xf32>
    %63 = vector.broadcast %61 : vector<1x128xf32> to vector<8x128xf32>
    %64 = arith.subf %62, %63 : vector<8x128xf32>
    %65 = vector.extract_strided_slice %2 {offsets = [5, 0], sizes = [1, 128], strides = [1, 1]} : vector<8x128xf32> to vector<1x128xf32>
    %66 = vector.broadcast %65 : vector<1x128xf32> to vector<8x128xf32>
    %67 = arith.mulf %64, %66 : vector<8x128xf32>
    %68 = arith.mulf %67, %67 : vector<8x128xf32>
    %69 = arith.maximumf %58, %68 : vector<8x128xf32>
    %70 = arith.minimumf %59, %68 : vector<8x128xf32>
    %71 = vector.extract_strided_slice %0 {offsets = [0, 6], sizes = [8, 1], strides = [1, 1]} : vector<8x8xf32> to vector<8x1xf32>
    %72 = vector.extract_strided_slice %1 {offsets = [6, 0], sizes = [1, 128], strides = [1, 1]} : vector<8x128xf32> to vector<1x128xf32>
    %73 = vector.broadcast %71 : vector<8x1xf32> to vector<8x128xf32>
    %74 = vector.broadcast %72 : vector<1x128xf32> to vector<8x128xf32>
    %75 = arith.subf %73, %74 : vector<8x128xf32>
    %76 = vector.extract_strided_slice %2 {offsets = [6, 0], sizes = [1, 128], strides = [1, 1]} : vector<8x128xf32> to vector<1x128xf32>
    %77 = vector.broadcast %76 : vector<1x128xf32> to vector<8x128xf32>
    %78 = arith.mulf %75, %77 : vector<8x128xf32>
    %79 = arith.mulf %78, %78 : vector<8x128xf32>
    %80 = arith.maximumf %69, %79 : vector<8x128xf32>
    %81 = arith.minimumf %70, %79 : vector<8x128xf32>
    %82 = vector.extract_strided_slice %0 {offsets = [0, 7], sizes = [8, 1], strides = [1, 1]} : vector<8x8xf32> to vector<8x1xf32>
    %83 = vector.extract_strided_slice %1 {offsets = [7, 0], sizes = [1, 128], strides = [1, 1]} : vector<8x128xf32> to vector<1x128xf32>
    %84 = vector.broadcast %82 : vector<8x1xf32> to vector<8x128xf32>
    %85 = vector.broadcast %83 : vector<1x128xf32> to vector<8x128xf32>
    %86 = arith.subf %84, %85 : vector<8x128xf32>
    %87 = vector.extract_strided_slice %2 {offsets = [7, 0], sizes = [1, 128], strides = [1, 1]} : vector<8x128xf32> to vector<1x128xf32>
    %88 = vector.broadcast %87 : vector<1x128xf32> to vector<8x128xf32>
    %89 = arith.mulf %86, %88 : vector<8x128xf32>
    %90 = arith.mulf %89, %89 : vector<8x128xf32>
    %91 = arith.maximumf %80, %90 : vector<8x128xf32>
    %92 = arith.minimumf %81, %90 : vector<8x128xf32>
    %cst = arith.constant 0.000000e+00 : f32
    %93 = vector.broadcast %cst : f32 to vector<8x128xf32>
    %94 = arith.subf %93, %91 : vector<8x128xf32>
    %95 = math.exp %94 : vector<8x128xf32>
    %cst_13 = arith.constant 0.000000e+00 : f32
    %96 = vector.broadcast %cst_13 : f32 to vector<8x128xf32>
    %97 = arith.subf %96, %92 : vector<8x128xf32>
    %98 = math.exp %97 : vector<8x128xf32>
    %cst_14 = arith.constant dense<0.000000e+00> : vector<8x128xf32>
    %99 = tpu.matmul %95, %3, %cst_14 {dimension_numbers = #tpu.dot_dimension_numbers<[1], [0], [0], [1], [0, 0, 1, 1], [], []>} : vector<8x128xf32>, vector<128x128xf32>, vector<8x128xf32> -> vector<8x128xf32>
    %cst_15 = arith.constant dense<0.000000e+00> : vector<8x128xf32>
    %100 = tpu.matmul %98, %3, %cst_15 {dimension_numbers = #tpu.dot_dimension_numbers<[1], [0], [0], [1], [0, 0, 1, 1], [], []>} : vector<8x128xf32>, vector<128x128xf32>, vector<8x128xf32> -> vector<8x128xf32>
    %101 = vector.extract_strided_slice %99 {offsets = [0, 0], sizes = [8, 1], strides = [1, 1]} : vector<8x128xf32> to vector<8x1xf32>
    %102 = vector.extract_strided_slice %99 {offsets = [0, 1], sizes = [8, 1], strides = [1, 1]} : vector<8x128xf32> to vector<8x1xf32>
    %103 = vector.extract_strided_slice %99 {offsets = [0, 2], sizes = [8, 1], strides = [1, 1]} : vector<8x128xf32> to vector<8x1xf32>
    %104 = vector.extract_strided_slice %100 {offsets = [0, 0], sizes = [8, 1], strides = [1, 1]} : vector<8x128xf32> to vector<8x1xf32>
    %105 = vector.extract_strided_slice %100 {offsets = [0, 1], sizes = [8, 1], strides = [1, 1]} : vector<8x128xf32> to vector<8x1xf32>
    %106 = vector.extract_strided_slice %100 {offsets = [0, 2], sizes = [8, 1], strides = [1, 1]} : vector<8x128xf32> to vector<8x1xf32>
    %cst_16 = arith.constant 1.000000e+00 : f32
    %107 = vector.broadcast %cst_16 : f32 to vector<8x1xf32>
    %108 = arith.divf %107, %103 : vector<8x1xf32>
    %cst_17 = arith.constant 1.000000e+00 : f32
    %109 = vector.broadcast %cst_17 : f32 to vector<8x1xf32>
    %110 = arith.divf %109, %106 : vector<8x1xf32>
    %111 = arith.mulf %101, %108 : vector<8x1xf32>
    %112 = vector.broadcast %111 : vector<8x1xf32> to vector<8x8xf32>
    %113 = arith.mulf %0, %112 : vector<8x8xf32>
    %114 = arith.mulf %102, %108 : vector<8x1xf32>
    %115 = vector.broadcast %114 : vector<8x1xf32> to vector<8x8xf32>
    %116 = arith.addf %113, %115 : vector<8x8xf32>
    %117 = arith.mulf %104, %110 : vector<8x1xf32>
    %118 = vector.broadcast %117 : vector<8x1xf32> to vector<8x8xf32>
    %119 = arith.mulf %0, %118 : vector<8x8xf32>
    %120 = arith.mulf %105, %110 : vector<8x1xf32>
    %121 = vector.broadcast %120 : vector<8x1xf32> to vector<8x8xf32>
    %122 = arith.addf %119, %121 : vector<8x8xf32>
    %cst_18 = arith.constant dense<0.000000e+00> : vector<8x128xf32>
    %123 = tpu.matmul %116, %4, %cst_18 {dimension_numbers = #tpu.dot_dimension_numbers<[1], [0], [0], [1], [0, 0, 1, 1], [], []>} : vector<8x8xf32>, vector<8x128xf32>, vector<8x128xf32> -> vector<8x128xf32>
    %cst_19 = arith.constant dense<0.000000e+00> : vector<8x128xf32>
    %124 = tpu.matmul %122, %5, %cst_19 {dimension_numbers = #tpu.dot_dimension_numbers<[1], [0], [0], [1], [0, 0, 1, 1], [], []>} : vector<8x8xf32>, vector<8x128xf32>, vector<8x128xf32> -> vector<8x128xf32>
    %125 = arith.addf %123, %124 : vector<8x128xf32>
    %126 = vector.broadcast %6 : vector<1x128xf32> to vector<8x128xf32>
    %127 = arith.addf %125, %126 : vector<8x128xf32>
    %c0_20 = arith.constant 0 : index
    %c0_21 = arith.constant 0 : index
    %128 = vector.load %arg8[%c0_20, %c0_21] : memref<8x128xf32, #tpu.memory_space<vmem>>, vector<8x128xf32>
    tpu.vector_store %arg8[%c0_20, %c0_21], %127 {strides = array<i32>} : memref<8x128xf32, #tpu.memory_space<vmem>>, vector<8x128xf32>,
    return
  }
  func.func @transform_0(%arg0: i32) -> (i32, i32) {
    %c0_i32 = arith.constant 0 : i32
    %c0_i32_0 = arith.constant 0 : i32
    return %arg0, %c0_i32 : i32, i32
  }
  func.func @transform_1(%arg0: i32) -> (i32, i32) {
    %c0_i32 = arith.constant 0 : i32
    %c0_i32_0 = arith.constant 0 : i32
    %c0_i32_1 = arith.constant 0 : i32
    return %c0_i32, %c0_i32_0 : i32, i32
  }
  func.func @transform_2(%arg0: i32) -> (i32, i32) {
    %c0_i32 = arith.constant 0 : i32
    %c0_i32_0 = arith.constant 0 : i32
    %c0_i32_1 = arith.constant 0 : i32
    return %c0_i32, %c0_i32_0 : i32, i32
  }
  func.func @transform_3(%arg0: i32) -> (i32, i32) {
    %c0_i32 = arith.constant 0 : i32
    %c0_i32_0 = arith.constant 0 : i32
    %c0_i32_1 = arith.constant 0 : i32
    return %c0_i32, %c0_i32_0 : i32, i32
  }
  func.func @transform_4(%arg0: i32) -> (i32, i32) {
    %c0_i32 = arith.constant 0 : i32
    %c0_i32_0 = arith.constant 0 : i32
    %c0_i32_1 = arith.constant 0 : i32
    return %c0_i32, %c0_i32_0 : i32, i32
  }
  func.func @transform_5(%arg0: i32) -> (i32, i32) {
    %c0_i32 = arith.constant 0 : i32
    %c0_i32_0 = arith.constant 0 : i32
    %c0_i32_1 = arith.constant 0 : i32
    return %c0_i32, %c0_i32_0 : i32, i32
  }
  func.func @transform_6(%arg0: i32) -> (i32, i32) {
    %c0_i32 = arith.constant 0 : i32
    %c0_i32_0 = arith.constant 0 : i32
    %c0_i32_1 = arith.constant 0 : i32
    return %c0_i32, %c0_i32_0 : i32, i32
  }
  func.func @transform_7(%arg0: i32) -> (i32, i32) {
    %c0_i32 = arith.constant 0 : i32
    %c0_i32_0 = arith.constant 0 : i32
    return %arg0, %c0_i32 : i32, i32
  }
}

</mosaic_0001>

<bundles_post_ra>
// kernel: tpu_custom_call.1
= control target key start
LH: loop header
LB: loop body
LE: loop exit
PB: predicated region body
PF: predicated region fallthrough
CT: control target
= control target key end

     0   :  { %12 = vsyncpa [#allocation3], 0  ;;  %s726_s0 = inlined_call_operand.hbm [shape: f32[8,8], index: 0, kind: input, shape index: {}]   ;;  %s727_s1 = inlined_call_operand.hbm [shape: f32[8,128], index: 1, kind: input, shape index: {}]   ;;  %s728_s2 = inlined_call_operand.hbm [shape: f32[8,128], index: 2, kind: input, shape index: {}]   ;;  %s729_s3 = inlined_call_operand.hbm [shape: f32[128,128], index: 3, kind: input, shape index: {}]   ;;  %s730_s4 = inlined_call_operand.hbm [shape: f32[8,128], index: 4, kind: input, shape index: {}]   ;;  %s731_s5 = inlined_call_operand.hbm [shape: f32[8,128], index: 5, kind: input, shape index: {}]   ;;  %s732_s6 = inlined_call_operand.vmem [shape: f32[1,128], index: 6, kind: input, shape index: {}]   ;;  %s733_s7 = inlined_call_operand.hbm [shape: f32[8,128], index: 7, kind: output, shape index: {}]  }
   0x1   :  { %13 = vsyncpa [#allocation6], 0 }
   0x2   :  { %14 = vsyncpa [#allocation9], 0 }
   0x3   :  { %15 = vsyncpa [#allocation12], 0  ;;  %s33_s26 = sshll.u32 %s727_s1, 4  ;;  %s34_s26 = int_to_ptr.hbm [resolvable:$true] %s33_s26 }
   0x4   :  { %16 = vsyncpa [#allocation4], 0  ;;  %s629_s27 = smov [#allocation5]   ;;  %s54_s8 = sshll.u32 %s729_s3, 4  ;;  %s55_s8 = int_to_ptr.hbm [resolvable:$true] %s54_s8 }
   0x5   :  { %s35_s28 = sshll.u32 %s629_s27, 4  ;;  %s630_s9 = smov [#allocation8]   ;;  %s36_s28 = int_to_ptr.vmem [resolvable:$true] %s35_s28 }
   0x6   :  { %38 = dma.hbm_to_vmem [thread:$0]  %s34_s26, 128, %s36_s28, [#allocation6]  }
   0x7   :  { %s56_s10 = sshll.u32 %s630_s9, 4  ;;  %s631_s11 = smov 128   ;;  %s57_s10 = int_to_ptr.vmem [resolvable:$true] %s56_s10 }
   0x8   :  { %s632_s12 = smov 8   ;;  %s22_s1 = sshll.u32 %s726_s0, 4  ;;  %s23_s1 = int_to_ptr.hbm [resolvable:$true] %s22_s1 }
   0x9   :  { %62 = dma.hbm_to_vmem [thread:$0]  %s55_s8, 2048, %s57_s10, [#allocation9], %s631_s11, %s631_s11, %s632_s12  }
   0xa   :  { %s633_s15 = smov [#allocation2]   ;;  %s44_s3 = sshll.u32 %s728_s2, 4  ;;  %s45_s3 = int_to_ptr.hbm [resolvable:$true] %s44_s3 }
   0xb   :  { %s24_s16 = sshll.u32 %s633_s15, 4  ;;  %s634_s19 = smov [#allocation7]   ;;  %s25_s16 = int_to_ptr.vmem [resolvable:$true] %s24_s16 }
   0xc   :  { %27 = dma.hbm_to_vmem [thread:$0]  %s23_s1, 128, %s25_s16, [#allocation3]  }
   0xd   :  { %s46_s20 = sshll.u32 %s634_s19, 4  ;;  %s68_s23 = sshll.u32 %s730_s4, 4  ;;  %s47_s20 = int_to_ptr.vmem [resolvable:$true] %s46_s20  ;;  %s69_s23 = int_to_ptr.hbm [resolvable:$true] %s68_s23 }
   0xe   :  { %49 = dma.hbm_to_vmem [thread:$0]  %s45_s3, 128, %s47_s20, [#allocation6]  }
   0xf   :  { %s79_s25 = sshll.u32 %s731_s5, 4  ;;  %s635_s26 = smov [#allocation10]   ;;  %s80_s25 = int_to_ptr.hbm [resolvable:$true] %s79_s25 }
  0x10   :  { %s70_s27 = sshll.u32 %s635_s26, 4  ;;  %s636_s2 = smov [#allocation11]   ;;  %s71_s27 = int_to_ptr.vmem [resolvable:$true] %s70_s27 }
  0x11   :  { %73 = dma.hbm_to_vmem [thread:$0]  %s69_s23, 128, %s71_s27, [#allocation9]  }
  0x12   :  { %s81_s28 = sshll.u32 %s636_s2, 4  ;;  %s82_s28 = int_to_ptr.vmem [resolvable:$true] %s81_s28 }
  0x13   :  { %84 = dma.hbm_to_vmem [thread:$0]  %s80_s25, 128, %s82_s28, [#allocation12]  }
  0x14   :  { %619 = dma.done.wait [#allocation3], 128  }
  0x15   :  { %620 = vsyncadd [#allocation3], 4294967168 }
  0x16   :  { %621 = dma.done.wait [#allocation6], 256  }
  0x17   :  { %622 = vsyncadd [#allocation6], 4294967040 }
  0x18   :  { %623 = dma.done.wait [#allocation9], 2176  }
  0x19   :  { %624 = vsyncadd [#allocation9], 4294965120 }
  0x1a   :  { %625 = dma.done.wait [#allocation12], 128  }
  0x1b   :  { %626 = vsyncadd [#allocation12], 4294967168  ;;  %v637_v0 = vmov 0   ;;  %v638_v1 = vmov 2   ;;  %v639_v2 = vmov 4   ;;  %v706_v3 = vld [vmem:[#allocation2] sm:$0xff] }
  0x1c   :  { %431 = vset.pattern.permute.xlu0 %v637_v0  ;;  %433 = vset.pattern.permute.xlu1 %v638_v1  ;;  %v640_v4 = vmov 1   ;;  %v641_v5 = vmov 3   ;;  %v642_v6 = vmov 5   ;;  %v643_v7 = vmov 6   ;;  %v129_v9 = vld [vmem:[#allocation8 + $0x78] sm:$0xff]  ;;  %v128_v10 = vld [vmem:[#allocation8 + $0x70] sm:$0xff] }
  0x1d   :  { %435 = vset.pattern.permute.xlu2 %v639_v2  ;;  %135 = vperm.xlu0 %431, %v706_v3   ;;  %v644_v8 = vmov 7   ;;  %v127_v11 = vld [vmem:[#allocation8 + $0x68] sm:$0xff]  ;;  %v126_v12 = vld [vmem:[#allocation8 + $0x60] sm:$0xff]  ;;  %v125_v13 = vld [vmem:[#allocation8 + $0x58] sm:$0xff]  ;;  %s645_s4 = smov 127   ;;  %s646_s5 = smov 126  }
  0x1e   :  { %155 = vperm.xlu1 %433, %v706_v3   ;;  %177 = vperm.xlu2 %435, %v706_v3   ;;  %v124_v14 = vld [vmem:[#allocation8 + $0x50] sm:$0xff]  ;;  %v123_v15 = vld [vmem:[#allocation8 + $0x48] sm:$0xff]  ;;  %v122_v16 = vld [vmem:[#allocation8 + $0x40] sm:$0xff]  ;;  %vm338_vm8 = vcmask 64512   ;;  %s647_s8 = smov [#allocation13]   ;;  %s397_s12 = sshll.u32 %s733_s7, 4  ;;  %s398_s12 = int_to_ptr.hbm [resolvable:$true] %s397_s12 }
  0x1f   :  { %226 = vmatpush.msra.mxu0 %v129_v9  ;;  %246 = vmatpush.msra.mxu1 %v129_v9  ;;  %v121_v18 = vld [vmem:[#allocation8 + $0x38] sm:$0xff]  ;;  %v120_v19 = vld [vmem:[#allocation8 + $0x30] sm:$0xff]  ;;  %v119_v20 = vld [vmem:[#allocation8 + $0x28] sm:$0xff]  ;;  %s395_s9 = sshll.u32 %s647_s8, 4  ;;  %s396_s9 = int_to_ptr.vmem [resolvable:$true] %s395_s9 }
  0x20   :  { %v112_v21 = vld [vmem:[#allocation5] sm:$0xff]  ;;  %v118_v22 = vld [vmem:[#allocation8 + $0x20] sm:$0xff]  ;;  %v117_v25 = vld [vmem:[#allocation8 + $0x18] sm:$0xff] }
  0x21   :  { %227 = vmatpush.msra.mxu0 %v128_v10  ;;  %247 = vmatpush.msra.mxu1 %v128_v10  ;;  %v116_v26 = vld [vmem:[#allocation8 + $0x10] sm:$0xff]  ;;  %v138_v27 = vperm.slane %v112_v21, 0  ;;  %v113_v28 = vld [vmem:[#allocation7] sm:$0xff]  ;;  %v115_v30 = vld [vmem:[#allocation8 + $0x8] sm:$0xff]  ;;  %v158_v31 = vperm.slane %v112_v21, 2  ;;  %v147_v35 = vperm.slane %v112_v21, 1 }
  0x22   :  { %v114_v32 = vld [vmem:[#allocation8] sm:$0xff]  ;;  %v140_v33 = vperm.slane %v113_v28, 0  ;;  %v169_v36 = vperm.slane %v112_v21, 3  ;;  %v180_v37 = vperm.slane %v112_v21, 4  ;;  %v160_v38 = vperm.slane %v113_v28, 2 }
  0x23   :  { %228 = vmatpush.msra.mxu0 %v127_v11  ;;  %248 = vmatpush.msra.mxu1 %v127_v11  ;;  %v149_v40 = vperm.slane %v113_v28, 1  ;;  %v171_v42 = vperm.slane %v113_v28, 3  ;;  %v191_v47 = vperm.slane %v112_v21, 5  ;;  %v182_v48 = vperm.slane %v113_v28, 4 }
  0x24   :  { %v213_v52 = vperm.slane %v112_v21, 7  ;;  %v193_v53 = vperm.slane %v113_v28, 5  ;;  %v202_v60 = vperm.slane %v112_v21, 6  ;;  %v215_v61 = vperm.slane %v113_v28, 7 }
  0x25   :  { %432 = vset.pattern.permute.xlu0 %v640_v4  ;;  %229 = vmatpush.msra.mxu0 %v126_v12  ;;  %v204_v2 = vperm.slane %v113_v28, 6 }
  0x26   :  { %434 = vset.pattern.permute.xlu1 %v641_v5  ;;  %144 = vperm.xlu0 %432, %v706_v3  }
  0x27   :  { %166 = vperm.xlu1 %434, %v706_v3   ;;  %436 = vset.pattern.permute.xlu2 %v642_v6 }
  0x28   :  { %188 = vperm.xlu2 %436, %v706_v3   ;;  %249 = vmatpush.msra.mxu1 %v126_v12 }
  0x29   :  { %230 = vmatpush.msra.mxu0 %v125_v13 }
  0x2a   :  { %250 = vmatpush.msra.mxu1 %v125_v13 }
  0x2b   :  { %231 = vmatpush.msra.mxu0 %v124_v14 }
  0x2c   :  { %251 = vmatpush.msra.mxu1 %v124_v14 }
  0x2d   :  { %232 = vmatpush.msra.mxu0 %v123_v15 }
  0x2e   :  { %252 = vmatpush.msra.mxu1 %v123_v15 }
  0x2f   :  { %437 = vset.pattern.permute.xlu1 %v643_v7  ;;  %233 = vmatpush.msra.mxu0 %v122_v16 }
  0x30   :  { %199 = vperm.xlu1 %437, %v706_v3   ;;  %438 = vset.pattern.permute.xlu2 %v644_v8 }
  0x31   :  { %210 = vperm.xlu2 %438, %v706_v3   ;;  %253 = vmatpush.msra.mxu1 %v122_v16 }
  0x32   :  { %234 = vmatpush.msra.mxu0 %v121_v18 }
  0x33   :  { %254 = vmatpush.msra.mxu1 %v121_v18 }
  0x34   :  { %235 = vmatpush.msra.mxu0 %v120_v19 }
  0x35   :  { %255 = vmatpush.msra.mxu1 %v120_v19 }
  0x36   :  { %236 = vmatpush.msra.mxu0 %v119_v20 }
  0x37   :  { %256 = vmatpush.msra.mxu1 %v119_v20 }
  0x38   :  { %439 = vset.pattern.permute.xlu1 %v637_v0  ;;  %237 = vmatpush.msra.mxu0 %v118_v22 }
  0x39   :  { %440 = vset.pattern.permute.xlu2 %v637_v0  ;;  %257 = vmatpush.msra.mxu1 %v118_v22 }
  0x3a   :  { %238 = vmatpush.msra.mxu0 %v117_v25 }
  0x3b   :  { %258 = vmatpush.msra.mxu1 %v117_v25 }
  0x3c   :  { %239 = vmatpush.msra.mxu0 %v116_v26 }
  0x3d   :  { %259 = vmatpush.msra.mxu1 %v116_v26 }
  0x3e   :  { %240 = vmatpush.msra.mxu0 %v115_v30 }
  0x3f   :  { %260 = vmatpush.msra.mxu1 %v115_v30 }
  0x40   :  { %241 = vmatpush.msra.mxu0 %v114_v32 }
  0x41   :  { %261 = vmatpush.msra.mxu1 %v114_v32 }
  0x78   :  { %v178_v17 = vpop.permute.xlu2 %177 }
  0x79   :  { %v181_v49 = vsub.f32 %v178_v17, %v180_v37 }
  0x7b   :  { %v183_v59 = vmul.f32 %v182_v48, %v181_v49 }
  0x7d   :  { %v184_v11 = vmul.f32 %v183_v59, %v183_v59 }
  0x82   :  { %v189_v29 = vpop.permute.xlu2 %188 }
  0x83   :  { %v192_v58 = vsub.f32 %v189_v29, %v191_v47 }
  0x85   :  { %v194_v8 = vmul.f32 %v193_v53, %v192_v58 }
  0x87   :  { %v195_v18 = vmul.f32 %v194_v8, %v194_v8 }
  0x8b   :  { %v211_v54 = vpop.permute.xlu2 %210 }
  0x8c   :  { %v214_v1 = vsub.f32 %v211_v54, %v213_v52 }
  0x8e   :  { %v216_v14 = vmul.f32 %v215_v61, %v214_v1 }
  0x8f   :  { %v136_v23 = vpop.permute.xlu0 %135 }
  0x90   :  { %v156_v24 = vpop.permute.xlu1 %155  ;;  %v139_v34 = vsub.f32 %v136_v23, %v138_v27  ;;  %v217_v22 = vmul.f32 %v216_v14, %v216_v14 }
  0x91   :  { %v159_v39 = vsub.f32 %v156_v24, %v158_v31 }
  0x92   :  { %v141_v44 = vmul.f32 %v140_v33, %v139_v34 }
  0x93   :  { %v161_v50 = vmul.f32 %v160_v38, %v159_v39 }
  0x94   :  { %v142_v55 = vmul.f32 %v141_v44, %v141_v44 }
  0x95   :  { %v162_v62 = vmul.f32 %v161_v50, %v161_v50 }
  0x98   :  { %v145_v41 = vpop.permute.xlu0 %144 }
  0x99   :  { %v167_v43 = vpop.permute.xlu1 %166  ;;  %v148_v45 = vsub.f32 %v145_v41, %v147_v35 }
  0x9a   :  { %v170_v46 = vsub.f32 %v167_v43, %v169_v36 }
  0x9b   :  { %v150_v51 = vmul.f32 %v149_v40, %v148_v45 }
  0x9c   :  { %v172_v57 = vmul.f32 %v171_v42, %v170_v46 }
  0x9d   :  { %v151_v56 = vmul.f32 %v150_v51, %v150_v51 }
  0x9e   :  { %v173_v7 = vmul.f32 %v172_v57, %v172_v57 }
  0x9f   :  { %v152_v63 = vmax.f32 %v142_v55, %v151_v56  ;;  %v153_v0 = vmin.f32 %v142_v55, %v151_v56 }
  0xa1   :  { %v163_v5 = vmax.f32 %v152_v63, %v162_v62  ;;  %v164_v6 = vmin.f32 %v153_v0, %v162_v62  ;;  %v130_v63 = vld [vmem:[#allocation10] sm:$0xff]  ;;  %v131_v0 = vld [vmem:[#allocation11] sm:$0xff] }
  0xa2   :  { %v200_v9 = vpop.permute.xlu1 %199  ;;  %380 = vmatpush.msra.mxu3 %v130_v63  ;;  %357 = vmatpush.msra.mxu2 %v131_v0 }
  0xa3   :  { %v203_v10 = vsub.f32 %v200_v9, %v202_v60  ;;  %v174_v12 = vmax.f32 %v163_v5, %v173_v7  ;;  %v175_v13 = vmin.f32 %v164_v6, %v173_v7 }
  0xa5   :  { %v205_v15 = vmul.f32 %v204_v2, %v203_v10  ;;  %v185_v16 = vmax.f32 %v174_v12, %v184_v11  ;;  %v186_v17 = vmin.f32 %v175_v13, %v184_v11 }
  0xa7   :  { %v206_v19 = vmul.f32 %v205_v15, %v205_v15  ;;  %v196_v20 = vmax.f32 %v185_v16, %v195_v18  ;;  %v197_v21 = vmin.f32 %v186_v17, %v195_v18 }
  0xa9   :  { %v207_v23 = vmax.f32 %v196_v20, %v206_v19  ;;  %v208_v24 = vmin.f32 %v197_v21, %v206_v19 }
  0xab   :  { %v218_v25 = vmax.f32 %v207_v23, %v217_v22  ;;  %v219_v26 = vmin.f32 %v208_v24, %v217_v22 }
  0xad   :  { %v220_v27 = vsub.f32 0.0, %v218_v25  ;;  %v223_v28 = vsub.f32 0.0, %v219_v26 }
  0xaf   :  { %v221_v29 = vmul.f32 1.442695, %v220_v27  ;;  %v224_v30 = vmul.f32 1.442695, %v223_v28 }
  0xb1   :  { %443 = vpow2.f32 %v221_v29 }
  0xb2   :  { %445 = vpow2.f32 %v224_v30 }
  0xb7   :  { %v444_v31 = vpop.eup %443 }
  0xb8   :  { %v446_v32 = vpop.eup %445  ;;  %242 = vmatmul.f32.vlgmr.msra.gmra.mxu0 %v444_v31 }
  0xb9   :  { %262 = vmatmul.f32.vlgmr.msra.gmra.mxu1 %v446_v32 }
 0x135   :  { %v243_v33 = vpop.f32.mrf.mxu0 }
 0x136   :  { %447 = vrcp.f32 %v243_v33  ;;  %v263_v34 = vpop.f32.mrf.mxu1  ;;  %v277_v41 = vand.u32 2147483648, %v243_v33  ;;  %v275_v44 = vand.u32 2147483647, %v243_v33  ;;  %vm271_vm2 = vweird.f32 %v243_v33 }
 0x137   :  { %449 = vrcp.f32 %v263_v34  ;;  %v292_v42 = vand.u32 2147483648, %v263_v34  ;;  %v290_v46 = vand.u32 2147483647, %v263_v34  ;;  %vm286_vm3 = vweird.f32 %v263_v34 }
 0x138   :  { %v278_v49 = vor.u32 1.1754944e-38, %v277_v41  ;;  %vm276_vm6 = vcmp.eq.f32.partialorder %v275_v44, 8.507059e+37 }
 0x139   :  { %v293_v50 = vor.u32 1.1754944e-38, %v292_v42  ;;  %vm291_vm7 = vcmp.eq.f32.partialorder %v290_v46, 8.507059e+37 }
 0x13c   :  { %v448_v35 = vpop.eup %447 }
 0x13d   :  { %v450_v36 = vpop.eup %449  ;;  %v267_v37 = vmul.f32 %v448_v35, %v243_v33  ;;  %vm272_vm0 = vweird.f32 %v448_v35 }
 0x13e   :  { %v282_v38 = vmul.f32 %v450_v36, %v263_v34  ;;  %vm287_vm1 = vweird.f32 %v450_v36  ;;  %vm273_vm4 = vmor %vm271_vm2, %vm272_vm0 }
 0x13f   :  { %v268_v39 = vsub.f32 1.0, %v267_v37  ;;  %vm288_vm5 = vmor %vm286_vm3, %vm287_vm1 }
 0x140   :  { %v283_v40 = vsub.f32 1.0, %v282_v38 }
 0x141   :  { %v269_v43 = vmul.f32 %v448_v35, %v268_v39 }
 0x142   :  { %v284_v45 = vmul.f32 %v450_v36, %v283_v40 }
 0x143   :  { %v270_v47 = vadd.f32 %v448_v35, %v269_v43 }
 0x144   :  { %v285_v48 = vadd.f32 %v450_v36, %v284_v45 }
 0x145   :  { %v274_v51 = vsel %vm273_vm4, %v448_v35, %v270_v47 }
 0x146   :  { %v289_v52 = vsel %vm288_vm5, %v450_v36, %v285_v48  ;;  %v279_v53 = vsel %vm276_vm6, %v278_v49, %v274_v51 }
 0x147   :  { %v294_v54 = vsel %vm291_vm7, %v293_v50, %v289_v52  ;;  %307 = vrot.lane.b32.xlu2 %v279_v53, %s645_s4  ;;  %297 = vrot.lane.b32.xlu0 %v279_v53, %s646_s5 }
 0x148   :  { %318 = vrot.lane.b32.xlu1 %v294_v54, %s646_s5 }
 0x14f   :  { %328 = vrot.lane.b32.xlu0 %v294_v54, %s645_s4 }
 0x1a1   :  { %v308_v55 = vpop.permute.xlu2 %307 }
 0x1a2   :  { %v310_v56 = vmul.f32 %v308_v55, %v243_v33 }
 0x1a4   :  { %313 = vperm.xlu0 %432, %v310_v56  }
 0x1b9   :  { %v298_v57 = vpop.permute.xlu0 %297 }
 0x1ba   :  { %v319_v58 = vpop.permute.xlu1 %318  ;;  %v300_v59 = vmul.f32 %v298_v57, %v243_v33 }
 0x1bb   :  { %v321_v60 = vmul.f32 %v319_v58, %v263_v34 }
 0x1bc   :  { %303 = vperm.xlu1 %439, %v300_v59  }
 0x1bd   :  { %324 = vperm.xlu2 %440, %v321_v60  }
 0x1c1   :  { %v329_v61 = vpop.permute.xlu0 %328 }
 0x1c2   :  { %v331_v62 = vmul.f32 %v329_v61, %v263_v34 }
 0x1c4   :  { %441 = vset.pattern.permute.xlu1 %v640_v4  ;;  %v442_v4 = vld [vmem:[%s732_s6] ss:$0 sm:$0xff] }
 0x1c5   :  { %334 = vperm.xlu1 %441, %v331_v62  }
 0x216   :  { %v314_v5 = vpop.permute.xlu0 %313 }
 0x217   :  { %v325_v7 = vpop.permute.xlu2 %324 }
 0x218   :  { %v327_v8 = vmul.f32 %v325_v7, %v706_v3 }
 0x22e   :  { %v304_v1 = vpop.permute.xlu1 %303 }
 0x22f   :  { %v306_v2 = vmul.f32 %v304_v1, %v706_v3 }
 0x231   :  { %v316_v6 = vadd.f32 %v314_v5, %v306_v2 }
 0x233   :  { %411 = vmatmul.msk.f32.vlgmr.msra.gmra.mxu3 %vm338_vm8, %v316_v6 }
 0x237   :  { %v335_v9 = vpop.permute.xlu1 %334 }
 0x238   :  { %v337_v10 = vadd.f32 %v335_v9, %v327_v8 }
 0x23a   :  { %410 = vmatmul.msk.f32.vlgmr.msra.gmra.mxu2 %vm338_vm8, %v337_v10 }
 0x2b6   :  { %v382_v11 = vpop.f32.mrf.mxu3 }
 0x2bd   :  { %v359_v12 = vpop.f32.mrf.mxu2 }
 0x2be   :  { %v383_v13 = vadd.f32 %v382_v11, %v359_v12 }
 0x2c0   :  { %v388_v14 = vadd.f32 %v442_v4, %v383_v13 }
 0x2c2   :  { %389 = vst [vmem:[#allocation13] sm:$0xff] %v388_v14 }
 0x2c3   :  { %400 = dma.vmem_to_hbm [thread:$0]  %s396_s9, 128, %s398_s12, [#allocation4]  }
 0x2c4   :  { %627 = dma.done.wait [#allocation4], 128  }
 0x2c5   :  { %628 = vsyncadd [#allocation4], 4294967168 }
 0x2c6   :  { %405 = vsyncpa [#allocation3], 1 }
 0x2c7   :  { %406 = vsyncpa [#allocation6], 1 }
 0x2c8   :  { %407 = vsyncpa [#allocation9], 1 }
 0x2c9   :  { %408 = vsyncpa [#allocation12], 1 }
 0x2ca   :  { %409 = vsyncpa [#allocation4], 1 }

</bundles_post_ra>
